<compile_context>
chip_gen: v7x
topology: tpu7x:2x2x1
jax: 0.10.0
libtpu: 0.0.40
codegen_flags: <defaults>
</compile_context>

<pallas_src>
import functools
import math

import jax
import jax.numpy as jnp
import numpy as np
from jax.experimental import pallas as pl
from jax.experimental.pallas import tpu as pltpu


def _round_up(x, m):
    return (x + m - 1) // m * m


# ----------------------------- Pallas kernel ---------------------------------

def _conv_layer_kernel(patches_ref, w_ref, b_ref, o_ref, acc_ref,
                       *, use_norm, use_lrelu):
    """One (sample, P-tile) output block, accumulated over the K grid axis.

    patches_ref: (1, tp, tk)   bf16 im2col patches
    w_ref:       (tk, OCp)     bf16 weights
    b_ref:       (1, OCp)      f32 bias
    o_ref:       (1, tp, OCp)  output (bf16 inter-layer / f32 final)
    acc_ref:     (tp, OCp)     f32 VMEM accumulator
    """
    k = pl.program_id(2)

    @pl.when(k == 0)
    def _():
        acc_ref[...] = jnp.zeros_like(acc_ref)

    acc_ref[...] += jnp.dot(patches_ref[0], w_ref[...],
                            preferred_element_type=jnp.float32)

    @pl.when(k == pl.num_programs(2) - 1)
    def _():
        y = acc_ref[...] + b_ref[...]                     # f32 epilogue
        if use_norm:
            # InstanceNorm2d defaults: affine=False, biased variance, eps=1e-5.
            # Only used when the P-tile spans the whole sample (tp == P).
            mean = jnp.mean(y, axis=0, keepdims=True)
            var = jnp.mean((y - mean) ** 2, axis=0, keepdims=True)
            y = (y - mean) * jax.lax.rsqrt(var + 1e-5)
        if use_lrelu:
            y = jnp.where(y > 0, y, 0.2 * y)              # LeakyReLU(0.2)
        o_ref[0] = y.astype(o_ref.dtype)


def _conv_layer_pallas(patches, w2d, b2d, *, use_norm, use_lrelu, out_dtype):
    """patches: (N, P, Kp) bf16, w2d: (Kp, OCp) bf16, b2d: (1, OCp) f32."""
    N, P, Kp = patches.shape
    OCp = w2d.shape[1]

    # K tile: multiple of 128, capped at 256 so double-buffered blocks fit v7x VMEM.
    tk = 256 if Kp % 256 == 0 else 128
    tk = min(tk, Kp)

    # P tile only on norm-free layers (InstanceNorm needs whole-sample stats).
    tp = P
    if not use_norm:
        for cand in (2048, 1024, 512, 256, 128):
            if P % cand == 0 and P // cand >= 2:
                tp = cand
                break

    grid = (N, P // tp, Kp // tk)
    kernel = functools.partial(_conv_layer_kernel,
                               use_norm=use_norm, use_lrelu=use_lrelu)
    return pl.pallas_call(
        kernel,
        out_shape=jax.ShapeDtypeStruct((N, P, OCp), out_dtype),
        grid_spec=pltpu.PrefetchScalarGridSpec(
            num_scalar_prefetch=0,
            grid=grid,
            in_specs=[
                pl.BlockSpec((1, tp, tk), lambda n, p, k: (n, p, k)),
                pl.BlockSpec((tk, OCp), lambda n, p, k: (k, 0)),
                pl.BlockSpec((1, OCp), lambda n, p, k: (0, 0)),
            ],
            out_specs=pl.BlockSpec((1, tp, OCp), lambda n, p, k: (n, p, 0)),
            scratch_shapes=[pltpu.VMEM((tp, OCp), jnp.float32)],
        ),
        compiler_params=pltpu.CompilerParams(
            dimension_semantics=("parallel", "parallel", "arbitrary"),
            vmem_limit_bytes=48 * 1024 * 1024,
        ),
    )(patches, w2d, b2d)


# ------------------------------ JAX glue --------------------------------------

def _im2col(x_nhwc, k=4, s=2, p=1):
    """x: [N,H,W,C] -> (patches [N, OH*OW, k*k*C], OH, OW). Row order (kh,kw,C)."""
    xp = jnp.pad(x_nhwc, ((0, 0), (p, p), (p, p), (0, 0)))
    N, Hp, Wp, C = xp.shape
    OH = (Hp - k) // s + 1
    OW = (Wp - k) // s + 1
    cols = []
    for i in range(k):
        for j in range(k):
            cols.append(xp[:, i::s, j::s, :][:, :OH, :OW, :])
    patches = jnp.stack(cols, axis=3)                     # [N, OH, OW, k*k, C]
    return patches.reshape(N, OH * OW, k * k * C), OH, OW


def _disc_layer(x_nhwc, w_hwio, b, *, stride, use_norm, use_lrelu, out_dtype):
    # TODO(synk): fuse im2col into the Pallas kernel (16 shifted-tap matmuls) to
    # avoid materializing the 4x-expanded patch tensor in HBM.
    patches, OH, OW = _im2col(x_nhwc.astype(jnp.bfloat16), k=4, s=stride, p=1)
    N = x_nhwc.shape[0]
    kh, kw, IC, OC = w_hwio.shape
    K = kh * kw * IC
    Kp = _round_up(K, 128)
    OCp = _round_up(OC, 128)

    if Kp != K:
        patches = jnp.pad(patches, ((0, 0), (0, 0), (0, Kp - K)))
    w2d = w_hwio.reshape(K, OC)                           # matches (kh,kw,C) patch order
    w2d = jnp.pad(w2d, ((0, Kp - K), (0, OCp - OC))).astype(jnp.bfloat16)
    b2d = jnp.pad(b.reshape(1, OC).astype(jnp.float32), ((0, 0), (0, OCp - OC)))

    out = _conv_layer_pallas(patches, w2d, b2d, use_norm=use_norm,
                             use_lrelu=use_lrelu, out_dtype=out_dtype)
    return out[:, :, :OC].reshape(N, OH, OW, OC)


def nlayer_discriminator(x_nchw, params):
    """Forward pass of NLayerDiscriminator. Input/output NCHW (PyTorch convention)."""
    x = jnp.transpose(x_nchw, (0, 2, 3, 1))               # NCHW -> NHWC
    (w1, b1), (w2, b2), (w3, b3), (w4, b4), (w5, b5) = params
    bf16 = jnp.bfloat16
    x = _disc_layer(x, w1, b1, stride=2, use_norm=False, use_lrelu=True,  out_dtype=bf16)
    x = _disc_layer(x, w2, b2, stride=2, use_norm=True,  use_lrelu=True,  out_dtype=bf16)
    x = _disc_layer(x, w3, b3, stride=2, use_norm=True,  use_lrelu=True,  out_dtype=bf16)
    x = _disc_layer(x, w4, b4, stride=2, use_norm=True,  use_lrelu=True,  out_dtype=bf16)
    x = _disc_layer(x, w5, b5, stride=1, use_norm=False, use_lrelu=False,
                    out_dtype=jnp.float32)
    return jnp.transpose(x, (0, 3, 1, 2))                 # NHWC -> NCHW


# --------------------- deterministic parameter init ---------------------------

def init_params(key, input_nc):
    # Weights stored in HWIO. Matches PyTorch Conv2d default (Kaiming-uniform-ish)
    # bounds; exact init values are synthetic (no checkpoint load).
    shapes = [
        (4, 4, input_nc, 64),
        (4, 4, 64, 128),
        (4, 4, 128, 256),
        (4, 4, 256, 512),
        (4, 4, 512, 1),
    ]
    params = []
    for sh in shapes:
        key, kw, kb = jax.random.split(key, 3)
        fan_in = sh[0] * sh[1] * sh[2]
        bound = 1.0 / math.sqrt(fan_in)
        w = jax.random.uniform(kw, sh, jnp.float32, -bound, bound)
        b = jax.random.uniform(kb, (sh[3],), jnp.float32, -bound, bound)
        params.append((w, b))
    return params


# ------------------------- pure-JAX reference ---------------------------------

def _ref_forward(x_nchw, params):
    x = jnp.transpose(x_nchw, (0, 2, 3, 1))

    def conv(x, w, b, s):
        y = jax.lax.conv_general_dilated(
            x, w, (s, s), [(1, 1), (1, 1)],
            dimension_numbers=("NHWC", "HWIO", "NHWC"))
        return y + b

    def inorm(x):
        m = jnp.mean(x, axis=(1, 2), keepdims=True)
        v = jnp.mean((x - m) ** 2, axis=(1, 2), keepdims=True)
        return (x - m) * jax.lax.rsqrt(v + 1e-5)

    def lrelu(x):
        return jnp.where(x > 0, x, 0.2 * x)

    (w1, b1), (w2, b2), (w3, b3), (w4, b4), (w5, b5) = params
    x = lrelu(conv(x, w1, b1, 2))
    x = lrelu(inorm(conv(x, w2, b2, 2)))
    x = lrelu(inorm(conv(x, w3, b3, 2)))
    x = lrelu(inorm(conv(x, w4, b4, 2)))
    x = conv(x, w5, b5, 1)
    return jnp.transpose(x, (0, 3, 1, 2))


# ----------------------------------- main --------------------------------------

if __name__ == "__main__":
    key = jax.random.PRNGKey(0)
    kx, kp = jax.random.split(key)

    # Note: the 4 stride-2 convs + final k=4,s=1,p=1 conv need spatial >= 32.
    N, input_nc, H, W = 2, 4, 32, 32
    x = jax.random.normal(kx, (N, input_nc, H, W), jnp.float32)
    params = init_params(kp, input_nc)

    out = nlayer_discriminator(x, params)
    out = jax.block_until_ready(out)
    assert out.shape == (N, 1, 1, 1), out.shape

    ref = _ref_forward(x, params)
    # bf16 MXU operands + bf16 inter-layer activations vs a pure-f32 reference:
    # tolerance loosened accordingly (f32 accumulation keeps the error small).
    np.testing.assert_allclose(np.asarray(out), np.asarray(ref),
                               rtol=5e-2, atol=5e-2)

    print("KERNEL_OK")
</pallas_src>

<mosaic_0001>
module attributes {stable_mosaic.version = 11 : i64} {
  func.func @_conv_layer_kernel(%arg0: i32, %arg1: i32, %arg2: i32, %arg3: memref<1x128x128xbf16, #tpu.memory_space<vmem>>, %arg4: memref<128x128xbf16, #tpu.memory_space<vmem>>, %arg5: memref<1x128xf32, #tpu.memory_space<vmem>>, %arg6: memref<1x128x128xbf16, #tpu.memory_space<vmem>>, %arg7: memref<128x128xf32, #tpu.memory_space<vmem>>) attributes {dimension_semantics = [#tpu.dimension_semantics<parallel>, #tpu.dimension_semantics<parallel>, #tpu.dimension_semantics<arbitrary>], iteration_bounds = array<i64: 2, 2, 1>, scalar_prefetch = 0 : i64, scratch_operands = 1 : i64, tpu.core_type = #tpu.core_type<tc>, window_params = [{transform_indices = @transform_0, window_bounds = array<i64: 1, 128, 128>}, {transform_indices = @transform_1, window_bounds = array<i64: 128, 128>}, {pipeline_mode = #tpu.pipeline_mode<synchronous>, transform_indices = @transform_2, window_bounds = array<i64: 1, 128>}, {transform_indices = @transform_3, window_bounds = array<i64: 1, 128, 128>}]} {
    %c0_i32 = arith.constant 0 : i32
    %0 = arith.cmpi eq, %arg2, %c0_i32 : i32
    %1 = arith.extui %0 : i1 to i32
    %c0_i32_0 = arith.constant 0 : i32
    %2 = arith.cmpi ne, %1, %c0_i32_0 : i32
    scf.if %2 {
      %cst_11 = arith.constant 0.000000e+00 : f32
      %13 = vector.broadcast %cst_11 : f32 to vector<128x128xf32>
      %c0_12 = arith.constant 0 : index
      %c0_13 = arith.constant 0 : index
      %14 = vector.load %arg7[%c0_12, %c0_13] : memref<128x128xf32, #tpu.memory_space<vmem>>, vector<128x128xf32>
      tpu.vector_store %arg7[%c0_12, %c0_13], %13 {strides = array<i32>} : memref<128x128xf32, #tpu.memory_space<vmem>>, vector<128x128xf32>,
    } else {
    }
    %c0 = arith.constant 0 : index
    %c0_1 = arith.constant 0 : index
    %3 = vector.load %arg7[%c0, %c0_1] : memref<128x128xf32, #tpu.memory_space<vmem>>, vector<128x128xf32>
    %c0_2 = arith.constant 0 : index
    %c0_3 = arith.constant 0 : index
    %c0_4 = arith.constant 0 : index
    %4 = vector.load %arg3[%c0_2, %c0_3, %c0_4] : memref<1x128x128xbf16, #tpu.memory_space<vmem>>, vector<1x128x128xbf16>
    %5 = vector.shape_cast %4 : vector<1x128x128xbf16> to vector<128x128xbf16>
    %c0_5 = arith.constant 0 : index
    %c0_6 = arith.constant 0 : index
    %6 = vector.load %arg4[%c0_5, %c0_6] : memref<128x128xbf16, #tpu.memory_space<vmem>>, vector<128x128xbf16>
    %cst = arith.constant dense<0.000000e+00> : vector<128x128xf32>
    %7 = tpu.matmul %5, %6, %cst {dimension_numbers = #tpu.dot_dimension_numbers<[1], [0], [0], [1], [0, 0, 1, 1], [], []>} : vector<128x128xbf16>, vector<128x128xbf16>, vector<128x128xf32> -> vector<128x128xf32>
    %8 = arith.addf %3, %7 : vector<128x128xf32>
    %c0_7 = arith.constant 0 : index
    %c0_8 = arith.constant 0 : index
    %9 = vector.load %arg7[%c0_7, %c0_8] : memref<128x128xf32, #tpu.memory_space<vmem>>, vector<128x128xf32>
    tpu.vector_store %arg7[%c0_7, %c0_8], %8 {strides = array<i32>} : memref<128x128xf32, #tpu.memory_space<vmem>>, vector<128x128xf32>,
    %c0_i32_9 = arith.constant 0 : i32
    %10 = arith.cmpi eq, %arg2, %c0_i32_9 : i32
    %11 = arith.extui %10 : i1 to i32
    %c0_i32_10 = arith.constant 0 : i32
    %12 = arith.cmpi ne, %11, %c0_i32_10 : i32
    scf.if %12 {
      %c0_11 = arith.constant 0 : index
      %c0_12 = arith.constant 0 : index
      %13 = vector.load %arg7[%c0_11, %c0_12] : memref<128x128xf32, #tpu.memory_space<vmem>>, vector<128x128xf32>
      %c0_13 = arith.constant 0 : index
      %c0_14 = arith.constant 0 : index
      %14 = vector.load %arg5[%c0_13, %c0_14] : memref<1x128xf32, #tpu.memory_space<vmem>>, vector<1x128xf32>
      %15 = vector.broadcast %14 : vector<1x128xf32> to vector<128x128xf32>
      %16 = arith.addf %13, %15 : vector<128x128xf32>
      %cst_15 = arith.constant 0.000000e+00 : f32
      %17 = vector.broadcast %cst_15 : f32 to vector<128x128xf32>
      %18 = arith.cmpf ogt, %16, %17 : vector<128x128xf32>
      %cst_16 = arith.constant 2.000000e-01 : f32
      %19 = vector.broadcast %cst_16 : f32 to vector<128x128xf32>
      %20 = arith.mulf %19, %16 : vector<128x128xf32>
      %21 = arith.select %18, %16, %20 : vector<128x128xi1>, vector<128x128xf32>
      %22 = arith.truncf %21 : vector<128x128xf32> to vector<128x128xbf16>
      %c0_17 = arith.constant 0 : index
      %c0_18 = arith.constant 0 : index
      %c0_19 = arith.constant 0 : index
      %23 = vector.load %arg6[%c0_17, %c0_18, %c0_19] : memref<1x128x128xbf16, #tpu.memory_space<vmem>>, vector<1x128x128xbf16>
      %24 = vector.shape_cast %23 : vector<1x128x128xbf16> to vector<128x128xbf16>
      %25 = vector.shape_cast %22 : vector<128x128xbf16> to vector<1x128x128xbf16>
      tpu.vector_store %arg6[%c0_17, %c0_18, %c0_19], %25 {strides = array<i32>} : memref<1x128x128xbf16, #tpu.memory_space<vmem>>, vector<1x128x128xbf16>,
    } else {
    }
    return
  }
  func.func @transform_0(%arg0: i32, %arg1: i32, %arg2: i32) -> (i32, i32, i32) {
    %c0_i32 = arith.constant 0 : i32
    return %arg0, %arg1, %arg2 : i32, i32, i32
  }
  func.func @transform_1(%arg0: i32, %arg1: i32, %arg2: i32) -> (i32, i32) {
    %c0_i32 = arith.constant 0 : i32
    %c0_i32_0 = arith.constant 0 : i32
    return %arg2, %c0_i32 : i32, i32
  }
  func.func @transform_2(%arg0: i32, %arg1: i32, %arg2: i32) -> (i32, i32) {
    %c0_i32 = arith.constant 0 : i32
    %c0_i32_0 = arith.constant 0 : i32
    %c0_i32_1 = arith.constant 0 : i32
    return %c0_i32, %c0_i32_0 : i32, i32
  }
  func.func @transform_3(%arg0: i32, %arg1: i32, %arg2: i32) -> (i32, i32, i32) {
    %c0_i32 = arith.constant 0 : i32
    %c0_i32_0 = arith.constant 0 : i32
    return %arg0, %arg1, %c0_i32 : i32, i32, i32
  }
}

</mosaic_0001>

<bundles_post_ra>
// kernel: tpu_custom_call.1
= control target key start
LH: loop header
LB: loop body
LE: loop exit
PB: predicated region body
PF: predicated region fallthrough
CT: control target
= control target key end

     0   :  { %s1605_s0 = inlined_call_operand.hbm [shape: bf16[2,256,128], index: 0, kind: input, shape index: {}]   ;;  %s1606_s1 = inlined_call_operand.hbm [shape: bf16[128,128], index: 1, kind: input, shape index: {}]   ;;  %s1607_s2 = inlined_call_operand.vmem [shape: f32[1,128], index: 2, kind: input, shape index: {}]   ;;  %s1608_s3 = inlined_call_operand.hbm [shape: bf16[2,256,128], index: 3, kind: output, shape index: {}]  }
   0x1   :  { %1619 = sst [smem:[#allocation16_spill]] %s1606_s1 }
   0x2   :  { %8 = vsyncpa [#allocation4], 0 }
   0x3   :  { %10 = vsyncpa [#allocation4 + $0x1], 0 }
   0x4   :  { %11 = vsyncpa [#allocation7], 0 }
   0x5   :  { %12 = vsyncpa [#allocation5], 0 }
   0x6   :  { %14 = vsyncpa [#allocation5 + $0x1], 0  ;;  %s1306_s12 = smov 0   ;;  %s1308_s13 = smov 0  }
   0x7   :  { %s1310_s14 = smov 0   ;;  %s1312_s15 = smov 0  }
   0x8   :  { %s1314_s16 = smov 0   ;;  %s1316_s17 = smov 0  }
   0x9   :  { %s1318_s18 = smov 0   ;;  %s1320_s19 = smov 0  }
   0xa LB: > { %1620 = sst [smem:[#allocation12_spill]] %s1269_s17  ;;  %s829_s20 = sadd.s32 4294967295, %s1277_s19   ;;  %s1277_s19 = sphi %s1320_s19, %s20_s19   ;;  %s1273_s18 = sphi %s1318_s18, %s1649_s18   ;;  %s1269_s17 = sphi %s1316_s17, %s1643_s17   ;;  %s1265_s16 = sphi %s1314_s16, %s1648_s16   ;;  %s1261_s15 = sphi %s1312_s15, %s1642_s15   ;;  %s1257_s14 = sphi %s1310_s14, %s1647_s14   ;;  %s1253_s13 = sphi %s1308_s13, %s1646_s13   ;;  %s1249_s12 = sphi %s1306_s12, %s1645_s12  }
   0xb   : > { %s830_s21 = sadd.s32 4294967294, %s1277_s19   ;;  %p63_p0 = scmp.ne.s32.totalorder %s1253_s13, %s1249_s12 }
   0xc   : > { %p1350_p1 = scmp.eq.s32.totalorder %s829_s20, 0  ;;  %p1354_p2 = scmp.eq.s32.totalorder %s829_s20, 3 }
   0xd   : > { %p142_p3 = scmp.eq.s32.totalorder %s830_s21, 3  ;;  %p831_p5 = scmp.ge.s32.totalorder %s1277_s19, 1 }
   0xe   : > { %s1621_s22 = scalar_select %p1350_p1, 1, 0 }
   0xf   : > { %s1622_s23 = scalar_select %p1354_p2, 1, 0 }
  0x10   : > { %p1360_p4 = por %p1350_p1, %p63_p0  ;;  %p1365_p6 = por %p142_p3, %p63_p0 }
  0x11   : > { %p149_p7 = scmp.lt.s32.totalorder %s1277_s19, 5  ;;  %s1279_s27 = smov [#allocation6]  }
  0x12   : > { %s1623_s24 = scalar_select %p1360_p4, 1, 0 }
  0x13   : > { %s1624_s25 = scalar_select %p1365_p6, 1, 0 }
  0x14   : > { %p1370_p8 = pnand %p831_p5, %p149_p7  ;;  %s164_s28 = sshll.u32 %s1279_s27, 4  ;;  %s165_s28 = int_to_ptr.vmem [resolvable:$true] %s164_s28 }
  0x15   : > { %1625 = sst [smem:[#allocation13_spill]] %s1624_s25  ;;  %s1628_s1 = sld [smem:[#allocation16_spill]] }
  0x16   : > { %s1626_s26 = scalar_select %p1370_p8, 1, 0 }
  0x17   : > { %p1016_p9 = pneg %p1370_p8 }
  0x19   : > { %p1378_p10 = pnand %p1016_p9, %p1350_p1 }
  0x1b   : > { %s1117_s5 = scalar_lea.hbm %s1628_s1, 1024  ;;  %p1119_p12 = pneg %p1378_p10 }
  0x1c   : > { %p1118_p11 = scmp.ne.s32.totalorder %s1628_s1, %s1117_s5  ;;  %p1124_p3 = scmp.lt.u32.totalorder %s1117_s5, %s1628_s1 }
  0x1e   : > { %p1120_p13 = pnand %p1119_p12, %p1118_p11 }
  0x20   : > { %p1121_p0 = pneg %p1120_p13 }
  0x22   : > { %p1126_p5 = pnand %p1124_p3, %p1121_p0 }
  0x24   : > { %1129 = shalt.err (!%p1126_p5)
}
  0x25   : > { %s1130_s10 = scalar_lea.vmem %s165_s28, 1024  ;;  %p1138_p1 = scmp.lt.s32.totalorder %s165_s28, %s165_s28 }
  0x26   : > { %p1131_p7 = scmp.ne.s32.totalorder %s165_s28, %s1130_s10  ;;  %p1139_p4 = scmp.lt.s32.totalorder %s1130_s10, %s1130_s10 }
  0x28   : > { %p1133_p9 = pnand %p1131_p7, %p1119_p12  ;;  %p1140_p8 = por %p1139_p4, %p1138_p1 }
  0x2a   : > { %p1134_p6 = pneg %p1133_p9 }
  0x2c   : > { %p1141_p2 = pnand %p1140_p8, %p1134_p6 }
  0x2e   : > { %1144 = shalt.err (!%p1141_p2)
}
  0x2f   : > { %s1613_s11 = smov 64   ;;  %s1614_s20 = smov 4  }
  0x30   : > { %1019 = dma.hbm_to_vmem [thread:$0]  (!%p1378_p10), %s1628_s1, 1024, %s165_s28, [#allocation7], %s1613_s11, %s1613_s11, %s1614_s20  }
  0x31   : > { %s35_s30 = sadd.s32 1, %s1269_s17  ;;  %s39_s4 = sadd.s32 1, %s1273_s18 }
  0x32   : > { %p37_p1 = scmp.ge.s32.totalorder %s35_s30, 2  ;;  %s50_s5 = sadd.s32 1, %s1257_s14 }
  0x33   : > { %p57_p2 = scmp.ne.s32.totalorder %s1257_s14, %s1253_s13  ;;  %p58_p4 = scmp.eq.s32.totalorder %s1277_s19, 0 }
  0x34   : > { %s1651_s30 = smov (%p37_p1, %s35_s30), 0  ;;  %s1653_s4 = smov (!%p37_p1, %s39_s4), %s1273_s18 }
  0x35   : > { %1629 = sst [smem:[#allocation14_spill]] %s1651_s30  ;;  %s44_s29 = ssub.s32 %s1269_s17, %s1651_s30 }
  0x36   : > { %p41_p6 = scmp.ge.s32.totalorder %s1653_s4, 2  ;;  %p1630_p8 = scmp.ne.s32.totalorder %s1622_s23, 0 }
  0x37   : > { %p1418_p10 = por %p58_p4, %p57_p2  ;;  %p1029_p12 = scmp.lt.s32.totalorder %s1277_s19, 4 }
  0x38   : > { %p1414_p11 = por %p1630_p8, %p57_p2  ;;  %s1655_s4 = smov (%p41_p6, %s1653_s4), 0 }
  0x39   : > { %1633 = sst [smem:[#allocation15_spill]] %s1655_s4  ;;  %s181_s7 = sand.u32 1, %s1257_s14  }
  0x3a   : > { %s835_s8 = sshll.u32 %s1269_s17, 4  ;;  %s43_s9 = ssub.s32 %s1273_s18, %s1655_s4 }
  0x3b   : > { %s45_s10 = sor.u32 %s44_s29, %s43_s9  ;;  %s834_s21 = sshll.u32 %s181_s7, 6 }
  0x3c   : > { %p48_p13 = scmp.eq.s32.totalorder %s45_s10, 0  ;;  %s836_s23 = sshll.u32 %s1273_s18, 5 }
  0x3d   : > { %s185_s27 = scalar_lea.vmem [#allocation3], %s834_s21  ;;  %s192_s1 = sadd.s32 %s836_s23, %s835_s8 }
  0x3e   : > { %s195_s11 = sshll.u32 %s185_s27, 4  ;;  %s837_s30 = sshll.u32 %s192_s1, 6  ;;  %s1433_s11 = int_to_ptr.vmem [resolvable:$true] %s195_s11 }
  0x3f   : > { %s1431_s20 = scalar_select %p48_p13, %s1257_s14, %s50_s5  }
  0x40   : > { %p1439_p0 = pnand %p1029_p12, %p1418_p10  ;;  %s1446_s29 = scalar_lea.hbm %s1605_s0, %s837_s30 }
  0x41   : > { %s1448_s5 = scalar_lea.sflag [#allocation4], %s181_s7  ;;  %s1145_s1 = scalar_lea.hbm %s1446_s29, 1024 }
  0x42   : > { %p1146_p3 = scmp.ne.s32.totalorder %s1446_s29, %s1145_s1  ;;  %p1147_p5 = pneg %p1439_p0 }
  0x43   : > { %s1150_s4 = scalar_lea.hbm %s1605_s0, 4096  ;;  %p1151_p1 = scmp.lt.u32.totalorder %s1446_s29, %s1605_s0 }
  0x44   : > { %p1148_p7 = pnand %p1147_p5, %p1146_p3  ;;  %p1152_p2 = scmp.lt.u32.totalorder %s1150_s4, %s1145_s1 }
  0x45   : > { %p1154_p6 = scmp.lt.u32.totalorder %s1145_s1, %s1446_s29 }
  0x46   : > { %p1149_p9 = pneg %p1148_p7  ;;  %p1153_p4 = por %p1152_p2, %p1151_p1 }
  0x48   : > { %p1155_p8 = por %p1154_p6, %p1153_p4 }
  0x4a   : > { %p1156_p10 = pnand %p1155_p8, %p1149_p9 }
  0x4c   : > { %1159 = shalt.err (!%p1156_p10)
}
  0x4d   : > { %s1160_s7 = scalar_lea.vmem %s1433_s11, 1024  ;;  %s1282_s9 = smov [#allocation3]  }
  0x4e   : > { %p1161_p12 = scmp.ne.s32.totalorder %s1433_s11, %s1160_s7  ;;  %s1165_s10 = sshll.u32 %s1282_s9, 4  ;;  %s1166_s10 = int_to_ptr.vmem [resolvable:$false] %s1165_s10 }
  0x4f   : > { %s1167_s21 = scalar_lea.vmem %s1166_s10, 2048  ;;  %p1168_p7 = scmp.lt.s32.totalorder %s1433_s11, %s1166_s10 }
  0x50   : > { %p1163_p13 = pnand %p1161_p12, %p1147_p5  ;;  %p1169_p1 = scmp.lt.s32.totalorder %s1167_s21, %s1160_s7 }
  0x52   : > { %p1164_p3 = pneg %p1163_p13  ;;  %p1170_p2 = por %p1169_p1, %p1168_p7 }
  0x54   : > { %p1171_p4 = pnand %p1170_p2, %p1164_p3 }
  0x56   : > { %1174 = shalt.err (!%p1171_p4)
}
  0x57   : > { %s1635_s23 = smov 4   ;;  %s1636_s27 = smov 64  }
  0x58   : > { %1023 = dma.hbm_to_vmem [thread:$0]  (!%p1439_p0), %s1446_s29, 1024, %s1433_s11, %s1448_s5, %s1636_s27, %s1636_s27, %s1635_s23  }
  0x59   : > { %p1637_p5 = scmp.ne.s32.totalorder %s1626_s26, 0 }
  0x5a   : > { %s1482_s1 = sand.u32 (!%p1637_p5), 1, %s1253_s13   ;;  %p1638_p9 = scmp.ne.s32.totalorder (!%p1637_p5), %s1623_s24, 0 }
  0x5b   : > { %207 = sbr.rel (%p1637_p5) target bundleno = 385 (0x181), region = 32  ;;  %s839_s28 = sshll.u32 (!%p1637_p5), %s1482_s1, 6 }
  0x5c   : > { %s210_s17 = scalar_lea.sflag (!%p1637_p5), [#allocation4], %s1482_s1  ;;  %s1488_s25 = scalar_lea.vmem (!%p1637_p5), [#allocation3], %s839_s28 }
  0x62   : > { %1236 = dma.done.wait (%p1638_p9), %s210_s17, 1024  }
  0x63   : > { %1238 = vsyncadd (%p1638_p9), %s210_s17, 4294966272  ;;  %p1639_p0 = scmp.ne.s32.totalorder %s1621_s22, 0 }
  0x65   : > { %1240 = dma.done.wait (%p1639_p0), [#allocation7], 1024  }
  0x66   : > { %1242 = vsyncadd (%p1639_p0), [#allocation7], 4294966272  ;;  %v1101_v0 = vld [vmem:[#allocation6] sm:$0xff]   ;;  %v1102_v1 = vld [vmem:[#allocation6 + $0x8] sm:$0xff]   ;;  %s1525_s26 = scalar_lea.vmem [#allocation8], %s839_s28  ;;  %s876_s11 = sshll.u32 %s1261_s15, 4 }
  0x67   : > { %960 = vmatprep.subr.bf16.mxu0 %v1101_v0  ;;  %992 = vmatprep.subr.bf16.mxu1 %v1101_v0  ;;  %v1103_v2 = vld [vmem:[#allocation6 + $0x10] sm:$0xff]   ;;  %v1104_v3 = vld [vmem:[#allocation6 + $0x18] sm:$0xff]   ;;  %v1109_v4 = vld [vmem:[%s1488_s25] sm:$0xff]   ;;  %s877_s29 = sshll.u32 %s1265_s16, 5  ;;  %s723_s16 = sshll.u32 %s1525_s26, 4  ;;  %s1549_s16 = int_to_ptr.vmem [resolvable:$true] %s723_s16 }
  0x68   : > { %961 = vmatpush3.bf16.msra.mxu0 %v1101_v0  ;;  %1000 = vmatpush3.bf16.msra.mxu1 %v1101_v0  ;;  %v1110_v5 = vld [vmem:[%s1488_s25 + $0x20] sm:$0xff]   ;;  %v1106_v7 = vld [vmem:[#allocation6 + $0x28] sm:$0xff]   ;;  %v1107_v8 = vld [vmem:[#allocation6 + $0x30] sm:$0xff]   ;;  %s720_s5 = sadd.s32 %s877_s29, %s876_s11  ;;  %s708_s7 = scalar_lea.sflag [#allocation5], %s1482_s1 }
  0x69   : > { %962 = vmatprep.subr.bf16.mxu0 %v1102_v1  ;;  %993 = vmatprep.subr.bf16.mxu1 %v1102_v1  ;;  %v1105_v6 = vld [vmem:[#allocation6 + $0x20] sm:$0xff]   ;;  %v1108_v9 = vld [vmem:[#allocation6 + $0x38] sm:$0xff]   ;;  %v1111_v10 = vld [vmem:[%s1488_s25 + $0x8] sm:$0xff]   ;;  %s878_s15 = sshll.u32 %s720_s5, 6  ;;  %s1175_s9 = scalar_lea.vmem %s1549_s16, 1024 }
  0x6a   : > { %976 = vmatprep.mubr.bf16.mxu0 %v1109_v4  ;;  %984 = vmatprep.mubr.bf16.mxu1 %v1110_v5  ;;  %v1112_v11 = vld [vmem:[%s1488_s25 + $0x28] sm:$0xff]   ;;  %v1113_v12 = vld [vmem:[%s1488_s25 + $0x10] sm:$0xff]   ;;  %v1115_v14 = vld [vmem:[%s1488_s25 + $0x18] sm:$0xff]   ;;  %s1547_s8 = scalar_lea.hbm %s1608_s3, %s878_s15  ;;  %p1176_p6 = scmp.ne.s32.totalorder %s1549_s16, %s1175_s9 }
  0x6b   : > { %v1114_v13 = vld [vmem:[%s1488_s25 + $0x30] sm:$0xff]   ;;  %v1116_v15 = vld [vmem:[%s1488_s25 + $0x38] sm:$0xff]   ;;  %v1509_v16 = vld [vmem:[%s1607_s2] ss:$0 sm:$0xff]  ;;  %s1283_s10 = smov [#allocation8]  }
  0x6c   : > { %963 = vmatpush3.bf16.msra.mxu0 %v1102_v1  ;;  %1001 = vmatpush3.bf16.msra.mxu1 %v1102_v1  ;;  %p1177_p8 = pnand %p1176_p6, %p1414_p11  ;;  %s1179_s21 = sshll.u32 %s1283_s10, 4  ;;  %s1180_s21 = int_to_ptr.vmem [resolvable:$false] %s1179_s21 }
  0x6d   : > { %964 = vmatprep.subr.bf16.mxu0 %v1103_v2  ;;  %994 = vmatprep.subr.bf16.mxu1 %v1103_v2  ;;  %s1181_s23 = scalar_lea.vmem %s1180_s21, 2048  ;;  %p1182_p12 = scmp.lt.s32.totalorder %s1549_s16, %s1180_s21 }
  0x6e   : > { %p1178_p10 = pneg %p1177_p8  ;;  %p1183_p13 = scmp.lt.s32.totalorder %s1181_s23, %s1175_s9 }
  0x70   : > { %965 = vmatpush3.bf16.msra.mxu0 %v1103_v2  ;;  %1002 = vmatpush3.bf16.msra.mxu1 %v1103_v2  ;;  %p1184_p3 = por %p1183_p13, %p1182_p12 }
  0x71   : > { %966 = vmatprep.subr.bf16.mxu0 %v1104_v3  ;;  %995 = vmatprep.subr.bf16.mxu1 %v1104_v3 }
  0x72   : > { %p1185_p7 = pnand %p1184_p3, %p1178_p10 }
  0x74   : > { %967 = vmatpush3.bf16.msra.mxu0 %v1104_v3  ;;  %1003 = vmatpush3.bf16.msra.mxu1 %v1104_v3 }
  0x75   : > { %968 = vmatprep.subr.bf16.mxu0 %v1105_v6  ;;  %996 = vmatprep.subr.bf16.mxu1 %v1105_v6 }
  0x78   : > { %969 = vmatpush3.bf16.msra.mxu0 %v1105_v6  ;;  %1004 = vmatpush3.bf16.msra.mxu1 %v1105_v6 }
  0x79   : > { %970 = vmatprep.subr.bf16.mxu0 %v1106_v7  ;;  %997 = vmatprep.subr.bf16.mxu1 %v1106_v7 }
  0x7c   : > { %971 = vmatpush3.bf16.msra.mxu0 %v1106_v7  ;;  %1005 = vmatpush3.bf16.msra.mxu1 %v1106_v7 }
  0x7d   : > { %972 = vmatprep.subr.bf16.mxu0 %v1107_v8  ;;  %998 = vmatprep.subr.bf16.mxu1 %v1107_v8 }
  0x80   : > { %973 = vmatpush3.bf16.msra.mxu0 %v1107_v8  ;;  %1006 = vmatpush3.bf16.msra.mxu1 %v1107_v8 }
  0x81   : > { %974 = vmatprep.subr.bf16.mxu0 %v1108_v9  ;;  %999 = vmatprep.subr.bf16.mxu1 %v1108_v9 }
  0x84   : > { %975 = vmatpush3.bf16.msra.mxu0 %v1108_v9  ;;  %1007 = vmatpush3.bf16.msra.mxu1 %v1108_v9 }
  0x87   : > { %977 = vmatmul.mubr.bf16.vlgmr.msra.gmra.mrb[0].mxu0 %v1111_v10  ;;  %985 = vmatmul.mubr.bf16.vlgmr.msra.gmra.mrb[0].mxu1 %v1112_v11 }
  0x88   : > { %980 = vmatprep.mubr.bf16.mxu0 %v1113_v12  ;;  %988 = vmatprep.mubr.bf16.mxu1 %v1114_v13 }
  0x8f   : > { %981 = vmatmul.mubr.bf16.gmra.mrb[4].mxu0 %v1115_v14  ;;  %989 = vmatmul.mubr.bf16.gmra.mrb[4].mxu1 %v1116_v15 }
 0x15a   : > { %v978_v17 = vpop.f32.mrb[0].mxu0  ;;  %v986_v18 = vpop.f32.mrb[0].mxu1 }
 0x15b   : > { %v565_v19 = vadd.f32 %v978_v17, %v1509_v16  ;;  %v573_v20 = vadd.f32 %v986_v18, %v1509_v16  ;;  %v442_v21 = vpop.f32.mrb[1].mxu0  ;;  %v474_v22 = vpop.f32.mrb[1].mxu1 }
 0x15c   : > { %v563_v23 = vadd.f32 %v1509_v16, %v442_v21  ;;  %v571_v24 = vadd.f32 %v1509_v16, %v474_v22  ;;  %v979_v25 = vpop.f32.mrb[2].mxu0  ;;  %v987_v26 = vpop.f32.mrb[2].mxu1 }
 0x15d   : > { %vm581_vm0 = vcmp.gt.f32.partialorder %v565_v19, 0.0  ;;  %v597_v27 = vmul.f32 0.2, %v565_v19  ;;  %vm589_vm1 = vcmp.gt.f32.partialorder %v573_v20, 0.0  ;;  %v605_v28 = vmul.f32 0.2, %v573_v20 }
 0x15e   : > { %vm579_vm2 = vcmp.gt.f32.partialorder %v563_v23, 0.0  ;;  %v595_v29 = vmul.f32 0.2, %v563_v23  ;;  %vm587_vm3 = vcmp.gt.f32.partialorder %v571_v24, 0.0  ;;  %v603_v30 = vmul.f32 0.2, %v571_v24 }
 0x15f   : > { %v566_v31 = vadd.f32 %v979_v25, %v1509_v16  ;;  %v574_v32 = vadd.f32 %v987_v26, %v1509_v16  ;;  %v445_v33 = vpop.f32.mrb[3].mxu0  ;;  %v477_v34 = vpop.f32.mrb[3].mxu1  ;;  %v613_v35 = vsel %vm581_vm0, %v565_v19, %v597_v27  ;;  %v621_v36 = vsel %vm589_vm1, %v573_v20, %v605_v28 }
 0x160   : > { %v564_v37 = vadd.f32 %v1509_v16, %v445_v33  ;;  %v572_v38 = vadd.f32 %v1509_v16, %v477_v34  ;;  %v611_v43 = vsel %vm579_vm2, %v563_v23, %v595_v29  ;;  %v619_v44 = vsel %vm587_vm3, %v571_v24, %v603_v30 }
 0x161   : > { %vm582_vm4 = vcmp.gt.f32.partialorder %v566_v31, 0.0  ;;  %v598_v39 = vmul.f32 0.2, %v566_v31  ;;  %vm590_vm5 = vcmp.gt.f32.partialorder %v574_v32, 0.0  ;;  %v606_v40 = vmul.f32 0.2, %v574_v32 }
 0x162   : > { %vm580_vm6 = vcmp.gt.f32.partialorder %v564_v37, 0.0  ;;  %v596_v41 = vmul.f32 0.2, %v564_v37  ;;  %vm588_vm7 = vcmp.gt.f32.partialorder %v572_v38, 0.0  ;;  %v604_v42 = vmul.f32 0.2, %v572_v38 }
 0x163   : > { %v614_v45 = vsel %vm582_vm4, %v566_v31, %v598_v39  ;;  %v622_v46 = vsel %vm590_vm5, %v574_v32, %v606_v40  ;;  %v982_v47 = vpop.f32.mrb[4].mxu0  ;;  %v990_v48 = vpop.f32.mrb[4].mxu1 }
 0x164   : > { %v905_v49 = vpack.c.bf16 %v614_v45, %v613_v35  ;;  %v925_v50 = vpack.c.bf16 %v622_v46, %v621_v36  ;;  %v612_v51 = vsel %vm580_vm6, %v564_v37, %v596_v41  ;;  %v620_v52 = vsel %vm588_vm7, %v572_v38, %v604_v42  ;;  %v458_v53 = vpop.f32.mrb[5].mxu0  ;;  %v490_v54 = vpop.f32.mrb[5].mxu1 }
 0x165   : > { %v900_v55 = vpack.c.bf16 %v612_v51, %v611_v43  ;;  %v920_v56 = vpack.c.bf16 %v620_v52, %v619_v44  ;;  %v569_v57 = vadd.f32 %v982_v47, %v1509_v16  ;;  %v577_v58 = vadd.f32 %v990_v48, %v1509_v16  ;;  %v983_v59 = vpop.f32.mrb[6].mxu0  ;;  %v991_v60 = vpop.f32.mrb[6].mxu1 }
 0x166   : > { %937 = vst [vmem:[%s1525_s26 + $0x8] sm:$0xff] %v905_v49   ;;  %941 = vst [vmem:[%s1525_s26 + $0x28] sm:$0xff] %v925_v50   ;;  %v567_v61 = vadd.f32 %v1509_v16, %v458_v53  ;;  %v575_v62 = vadd.f32 %v1509_v16, %v490_v54  ;;  %v570_v63 = vadd.f32 %v983_v59, %v1509_v16  ;;  %v461_v1 = vpop.f32.mrb[7].mxu0  ;;  %v493_v2 = vpop.f32.mrb[7].mxu1 }
 0x167   : > { %v578_v0 = vadd.f32 %v991_v60, %v1509_v16  ;;  %901 = vst [vmem:[%s1525_s26] sm:$0xff] %v900_v55   ;;  %940 = vst [vmem:[%s1525_s26 + $0x20] sm:$0xff] %v920_v56   ;;  %v601_v3 = vmul.f32 0.2, %v569_v57  ;;  %vm585_vm8 = vcmp.gt.f32.partialorder %v569_v57, 0.0  ;;  %v609_v4 = vmul.f32 0.2, %v577_v58 }
 0x168   : > { %vm593_vm9 = vcmp.gt.f32.partialorder %v577_v58, 0.0  ;;  %vm583_vm10 = vcmp.gt.f32.partialorder %v567_v61, 0.0  ;;  %vm586_vm11 = vcmp.gt.f32.partialorder %v570_v63, 0.0  ;;  %v602_v5 = vmul.f32 0.2, %v570_v63 }
 0x169   : > { %v599_v6 = vmul.f32 0.2, %v567_v61  ;;  %vm591_vm12 = vcmp.gt.f32.partialorder %v575_v62, 0.0  ;;  %vm594_vm13 = vcmp.gt.f32.partialorder %v578_v0, 0.0  ;;  %v610_v7 = vmul.f32 0.2, %v578_v0 }
 0x16a   : > { %v617_v8 = vsel %vm585_vm8, %v569_v57, %v601_v3  ;;  %v618_v9 = vsel %vm586_vm11, %v570_v63, %v602_v5  ;;  %v568_v10 = vadd.f32 %v1509_v16, %v461_v1  ;;  %v576_v11 = vadd.f32 %v1509_v16, %v493_v2 }
 0x16b   : > { %v625_v12 = vsel %vm593_vm9, %v577_v58, %v609_v4  ;;  %v607_v13 = vmul.f32 0.2, %v575_v62  ;;  %v915_v14 = vpack.c.bf16 %v618_v9, %v617_v8  ;;  %v626_v15 = vsel %vm594_vm13, %v578_v0, %v610_v7 }
 0x16c   : > { %v935_v17 = vpack.c.bf16 %v626_v15, %v625_v12  ;;  %vm584_vm14 = vcmp.gt.f32.partialorder %v568_v10, 0.0  ;;  %v600_v18 = vmul.f32 0.2, %v568_v10  ;;  %vm592_vm15 = vcmp.gt.f32.partialorder %v576_v11, 0.0 }
 0x16d   : > { %939 = vst [vmem:[%s1525_s26 + $0x18] sm:$0xff] %v915_v14   ;;  %v608_v19 = vmul.f32 0.2, %v576_v11  ;;  %v615_v20 = vsel %vm583_vm10, %v567_v61, %v599_v6  ;;  %v623_v21 = vsel %vm591_vm12, %v575_v62, %v607_v13 }
 0x16e   : > { %943 = vst [vmem:[%s1525_s26 + $0x38] sm:$0xff] %v935_v17   ;;  %v616_v16 = vsel %vm584_vm14, %v568_v10, %v600_v18 }
 0x16f   : > { %v910_v22 = vpack.c.bf16 %v616_v16, %v615_v20  ;;  %v624_v23 = vsel %vm592_vm15, %v576_v11, %v608_v19 }
 0x170   : > { %v930_v24 = vpack.c.bf16 %v624_v23, %v623_v21 }
 0x171   : > { %938 = vst [vmem:[%s1525_s26 + $0x10] sm:$0xff] %v910_v22  }
 0x172   : > { %942 = vst [vmem:[%s1525_s26 + $0x30] sm:$0xff] %v930_v24  }
 0x173   : > { %1188 = shalt.err (!%p1185_p7)
}
 0x174   : > { %s1189_s27 = scalar_lea.hbm %s1547_s8, 1024  ;;  %s1193_s25 = scalar_lea.hbm %s1608_s3, 4096 }
 0x175   : > { %p1190_p1 = scmp.ne.s32.totalorder %s1547_s8, %s1189_s27  ;;  %p1194_p5 = scmp.lt.u32.totalorder %s1547_s8, %s1608_s3 }
 0x176   : > { %p1195_p9 = scmp.lt.u32.totalorder %s1193_s25, %s1189_s27  ;;  %p1197_p6 = scmp.lt.u32.totalorder %s1189_s27, %s1547_s8 }
 0x177   : > { %p1191_p2 = pnand %p1190_p1, %p1414_p11 }
 0x178   : > { %p1196_p0 = por %p1195_p9, %p1194_p5 }
 0x179   : > { %p1192_p4 = pneg %p1191_p2 }
 0x17a   : > { %p1198_p8 = por %p1197_p6, %p1196_p0 }
 0x17c   : > { %p1199_p10 = pnand %p1198_p8, %p1192_p4 }
 0x17e   : > { %1202 = shalt.err (!%p1199_p10)
}
 0x17f   : > { %s1284_s26 = smov 64   ;;  %s1285_s11 = smov 4  }
 0x180   : > { %1014 = dma.vmem_to_hbm [thread:$0]  (%p1414_p11), %s1549_s16, 1024, %s1547_s8, %s708_s7, %s1284_s26, %s1284_s26, %s1285_s11  }
 0x181 PF: > { %s1640_s29 = sld [smem:[#allocation13_spill]]  ;;  %p1031_p12 = scmp.ge.s32.totalorder %s1277_s19, 2 }
 0x182   : > { %s738_s5 = sand.u32 1, %s1249_s12  }
 0x183   : > { %s739_s15 = scalar_lea.sflag [#allocation5], %s738_s5 }
 0x187   : > { %p1641_p13 = scmp.ne.s32.totalorder %s1640_s29, 0 }
 0x189   : > { %p1025_p3 = pnand %p1031_p12, %p1641_p13 }
 0x18b   : > { %1244 = dma.done.wait (!%p1025_p3), %s739_s15, 1024  }
 0x18c   : > { %1246 = vsyncadd (!%p1025_p3), %s739_s15, 4294966272  ;;  %s20_s19 = sadd.s32 1, %s1277_s19   ;;  %s1642_s15 = sld [smem:[#allocation12_spill]] }
 0x18d   : > { %p17_p7 = scmp.ge.s32.totalorder %s20_s19, 6   ;;  %s1643_s17 = sld [smem:[#allocation14_spill]] }
 0x18e   : > { %s1644_s6 = sld [smem:[#allocation15_spill]]  ;;  %s1645_s12 = smov %s1253_s13 }
 0x18f   : > { %s1646_s13 = smov %s1257_s14  ;;  %s1647_s14 = smov %s1431_s20 }
 0x190   : > { %s1648_s16 = smov %s1273_s18  ;;  %19 = sbr.rel (!%p17_p7) target bundleno = 10 (0xa), region = 90 }
 0x194   : > { %s1649_s18 = smov %s1644_s6 }
 0x197   :  { %744 = vsyncpa [#allocation4], 1 }
 0x198   :  { %746 = vsyncpa [#allocation4 + $0x1], 1 }
 0x199   :  { %747 = vsyncpa [#allocation7], 1 }
 0x19a   :  { %748 = vsyncpa [#allocation5], 1 }
 0x19b   :  { %750 = vsyncpa [#allocation5 + $0x1], 1 }

</bundles_post_ra>
